<compile_context>
chip_gen: v5e
topology: v5e:2x2
jax: 0.10.0
libtpu: 0.0.40
codegen_flags: <defaults>
</compile_context>

<pallas_src>
import functools

import jax
import jax.numpy as jnp
from jax.experimental import pallas as pl
from jax.experimental.pallas import tpu as pltpu

BN_EPS = 1e-5
_VMEM_LIMIT = 32 * 1024 * 1024   # conservative budget: valid on v5e/v6e/v7x
_MAX_TILE_N = 2048               # batch-tile (lane-axis) upper bound


def _pick_tile(n, max_tile=_MAX_TILE_N):
    """Largest batch tile that divides n and is a multiple of 128 (or all of n)."""
    if n <= max_tile:
        return n
    cand = (min(max_tile, n) // 128) * 128
    while cand >= 128:
        if n % cand == 0:
            return cand
        cand -= 128
    return n   # no aligned divisor: fall back to a single tile over the batch


def _layer_stats_kernel(scale_ref, shift_ref, h_ref, w_ref, b_ref,
                        out_ref, sum_ref, sumsq_ref):
    """Fused: previous-layer BN (scale/shift), linear, ReLU, stats accumulate.

    Shapes: h (Cin, Tn); scale/shift (Cin, 1); w (Cout, Cin); b (Cout, 1).
    """
    h = h_ref[...] * scale_ref[...] + shift_ref[...]            # fused BN apply
    y = jnp.dot(w_ref[...], h, preferred_element_type=jnp.float32) + b_ref[...]
    y = jnp.maximum(y, 0.0)
    out_ref[...] = y

    @pl.when(pl.program_id(0) == 0)
    def _init():
        sum_ref[...] = jnp.zeros_like(sum_ref)
        sumsq_ref[...] = jnp.zeros_like(sumsq_ref)

    # One sweep over y: sum and sum-of-squares along the lane (batch) axis.
    sum_ref[...] += jnp.sum(y, axis=1, keepdims=True)
    sumsq_ref[...] += jnp.sum(y * y, axis=1, keepdims=True)


def _layer_final_kernel(scale_ref, shift_ref, h_ref, w_ref, b_ref, out_ref):
    """Fused: previous-layer BN (scale/shift), linear, ReLU (no stats)."""
    h = h_ref[...] * scale_ref[...] + shift_ref[...]
    y = jnp.dot(w_ref[...], h, preferred_element_type=jnp.float32) + b_ref[...]
    out_ref[...] = jnp.maximum(y, 0.0)


def _layer_with_stats(h, scale, shift, w, b, tile_n):
    cin, n = h.shape
    cout = w.shape[0]
    return pl.pallas_call(
        _layer_stats_kernel,
        out_shape=(
            jax.ShapeDtypeStruct((cout, n), jnp.float32),   # next activations
            jax.ShapeDtypeStruct((cout, 1), jnp.float32),   # sum   over batch
            jax.ShapeDtypeStruct((cout, 1), jnp.float32),   # sumsq over batch
        ),
        grid=(n // tile_n,),
        in_specs=[
            pl.BlockSpec((cin, 1), lambda t: (0, 0)),        # scale  (resident)
            pl.BlockSpec((cin, 1), lambda t: (0, 0)),        # shift  (resident)
            pl.BlockSpec((cin, tile_n), lambda t: (0, t)),   # activation tile
            pl.BlockSpec((cout, cin), lambda t: (0, 0)),     # weight (resident)
            pl.BlockSpec((cout, 1), lambda t: (0, 0)),       # bias   (resident)
        ],
        out_specs=(
            pl.BlockSpec((cout, tile_n), lambda t: (0, t)),
            pl.BlockSpec((cout, 1), lambda t: (0, 0)),       # accumulator
            pl.BlockSpec((cout, 1), lambda t: (0, 0)),       # accumulator
        ),
        compiler_params=pltpu.CompilerParams(
            dimension_semantics=("arbitrary",),   # stats reduce across tiles
            vmem_limit_bytes=_VMEM_LIMIT,
        ),
    )(scale, shift, h, w, b)


def _layer_final(h, scale, shift, w, b, tile_n):
    cin, n = h.shape
    cout = w.shape[0]
    return pl.pallas_call(
        _layer_final_kernel,
        out_shape=jax.ShapeDtypeStruct((cout, n), jnp.float32),
        grid=(n // tile_n,),
        in_specs=[
            pl.BlockSpec((cin, 1), lambda t: (0, 0)),
            pl.BlockSpec((cin, 1), lambda t: (0, 0)),
            pl.BlockSpec((cin, tile_n), lambda t: (0, t)),
            pl.BlockSpec((cout, cin), lambda t: (0, 0)),
            pl.BlockSpec((cout, 1), lambda t: (0, 0)),
        ],
        out_specs=pl.BlockSpec((cout, tile_n), lambda t: (0, t)),
        compiler_params=pltpu.CompilerParams(
            dimension_semantics=("parallel",),    # independent tiles -> megacore
            vmem_limit_bytes=_VMEM_LIMIT,
        ),
    )(scale, shift, h, w, b)


@functools.partial(jax.jit, static_argnames=("tile_n",))
def network_forward(x, params, tile_n=None):
    """x: (N, dim_features) f32 -> (N, dim_target) f32 (forward of `Network`)."""
    n = x.shape[0]
    if tile_n is None:
        tile_n = _pick_tile(n)

    # Lane-dense layout: [features, batch] (batch on the 128-lane axis).
    h = jnp.transpose(x).astype(jnp.float32)
    inv_n = jnp.float32(1.0 / n)

    cin = h.shape[0]
    scale = jnp.ones((cin, 1), jnp.float32)    # identity (no BN before fc1)
    shift = jnp.zeros((cin, 1), jnp.float32)

    for i in (1, 2, 3):
        h, s, ss = _layer_with_stats(h, scale, shift,
                                     params[f"w{i}"], params[f"b{i}"], tile_n)
        # Fold training-mode BatchNorm into a single per-channel scale/shift.
        mu = s * inv_n
        var = ss * inv_n - mu * mu             # biased variance (one-sweep form)
        scale = params[f"g{i}"] * jax.lax.rsqrt(var + BN_EPS)
        shift = params[f"be{i}"] - mu * scale

    out = _layer_final(h, scale, shift, params["w4"], params["b4"], tile_n)
    return jnp.transpose(out)                  # back to (N, dim_target)


def init_params(key, dim_features, dim_target):
    """Synthetic parameters matching the PyTorch module's shapes.

    Linear weights are PyTorch-native [out, in]; biases and BatchNorm affine
    params are stored as [C, 1] columns for the lane-dense [C, N] layout.
    gamma/beta are randomized (instead of the 1/0 defaults) purely to exercise
    the affine code path in the correctness check.
    """
    dims = [(dim_features, 32), (32, 16), (16, 8), (8, dim_target)]
    params = {}
    keys = jax.random.split(key, 2 * len(dims) + 2 * 3)
    for i, (din, dout) in enumerate(dims):
        bound = 1.0 / (din ** 0.5)   # mimic PyTorch nn.Linear default init range
        params[f"w{i + 1}"] = jax.random.uniform(
            keys[2 * i], (dout, din), jnp.float32, -bound, bound)
        params[f"b{i + 1}"] = jax.random.uniform(
            keys[2 * i + 1], (dout, 1), jnp.float32, -bound, bound)
    for j, c in enumerate([32, 16, 8]):
        kg = keys[2 * len(dims) + 2 * j]
        kb = keys[2 * len(dims) + 2 * j + 1]
        params[f"g{j + 1}"] = jax.random.uniform(kg, (c, 1), jnp.float32, 0.5, 1.5)
        params[f"be{j + 1}"] = jax.random.uniform(kb, (c, 1), jnp.float32, -0.5, 0.5)
    return params


def _reference_forward(x, params):
    """Pure-JAX reference (standard [N, C] layout, two-pass BN stats)."""
    h = x
    for i in range(1, 5):
        w = params[f"w{i}"]            # (out, in)
        b = params[f"b{i}"][:, 0]      # (out,)
        h = jnp.maximum(h @ w.T + b, 0.0)
        if i < 4:
            mu = jnp.mean(h, axis=0, keepdims=True)
            var = jnp.mean((h - mu) ** 2, axis=0, keepdims=True)
            g = params[f"g{i}"][:, 0]
            be = params[f"be{i}"][:, 0]
            h = (h - mu) * jax.lax.rsqrt(var + BN_EPS) * g + be
    return h


if __name__ == "__main__":
    dim_features = 16
    dim_target = 4

    key = jax.random.PRNGKey(0)
    x_key, p_key, x2_key = jax.random.split(key, 3)
    params = init_params(p_key, dim_features, dim_target)

    # Small demo batch: single batch tile (grid of 1 per layer call).
    x = jax.random.normal(x_key, (8, dim_features), jnp.float32)
    out = jax.block_until_ready(network_forward(x, params))
    ref = _reference_forward(x, params)
    assert out.shape == (8, dim_target)
    assert jnp.allclose(out, ref, atol=1e-4, rtol=1e-3), "mismatch (batch=8)"

    # Slightly larger batch with a forced 128-row tile: exercises the
    # multi-tile grid and cross-tile BatchNorm statistics accumulation.
    x2 = jax.random.normal(x2_key, (256, dim_features), jnp.float32)
    out2 = jax.block_until_ready(network_forward(x2, params, tile_n=128))
    ref2 = _reference_forward(x2, params)
    assert out2.shape == (256, dim_target)
    assert jnp.allclose(out2, ref2, atol=1e-4, rtol=1e-3), "mismatch (batch=256)"

    print("KERNEL_OK")
</pallas_src>

<mosaic_0001>
module attributes {stable_mosaic.version = 11 : i64} {
  func.func @_layer_stats_kernel(%arg0: i32, %arg1: memref<16x1xf32, #tpu.memory_space<vmem>>, %arg2: memref<16x1xf32, #tpu.memory_space<vmem>>, %arg3: memref<16x8xf32, #tpu.memory_space<vmem>>, %arg4: memref<32x16xf32, #tpu.memory_space<vmem>>, %arg5: memref<32x1xf32, #tpu.memory_space<vmem>>, %arg6: memref<32x8xf32, #tpu.memory_space<vmem>>, %arg7: memref<32x1xf32, #tpu.memory_space<vmem>>, %arg8: memref<32x1xf32, #tpu.memory_space<vmem>>) attributes {dimension_semantics = [#tpu.dimension_semantics<arbitrary>], iteration_bounds = array<i64: 1>, scalar_prefetch = 0 : i64, scratch_operands = 0 : i64, tpu.core_type = #tpu.core_type<tc>, window_params = [{pipeline_mode = #tpu.pipeline_mode<synchronous>, transform_indices = @transform_0, window_bounds = array<i64: 16, 1>}, {pipeline_mode = #tpu.pipeline_mode<synchronous>, transform_indices = @transform_1, window_bounds = array<i64: 16, 1>}, {transform_indices = @transform_2, window_bounds = array<i64: 16, 8>}, {pipeline_mode = #tpu.pipeline_mode<synchronous>, transform_indices = @transform_3, window_bounds = array<i64: 32, 16>}, {pipeline_mode = #tpu.pipeline_mode<synchronous>, transform_indices = @transform_4, window_bounds = array<i64: 32, 1>}, {transform_indices = @transform_5, window_bounds = array<i64: 32, 8>}, {pipeline_mode = #tpu.pipeline_mode<synchronous>, transform_indices = @transform_6, window_bounds = array<i64: 32, 1>}, {pipeline_mode = #tpu.pipeline_mode<synchronous>, transform_indices = @transform_7, window_bounds = array<i64: 32, 1>}]} {
    %c0 = arith.constant 0 : index
    %c0_0 = arith.constant 0 : index
    %0 = vector.load %arg3[%c0, %c0_0] : memref<16x8xf32, #tpu.memory_space<vmem>>, vector<16x8xf32>
    %c0_1 = arith.constant 0 : index
    %c0_2 = arith.constant 0 : index
    %1 = vector.load %arg1[%c0_1, %c0_2] : memref<16x1xf32, #tpu.memory_space<vmem>>, vector<16x1xf32>
    %2 = vector.broadcast %1 : vector<16x1xf32> to vector<16x8xf32>
    %3 = arith.mulf %0, %2 : vector<16x8xf32>
    %c0_3 = arith.constant 0 : index
    %c0_4 = arith.constant 0 : index
    %4 = vector.load %arg2[%c0_3, %c0_4] : memref<16x1xf32, #tpu.memory_space<vmem>>, vector<16x1xf32>
    %5 = vector.broadcast %4 : vector<16x1xf32> to vector<16x8xf32>
    %6 = arith.addf %3, %5 : vector<16x8xf32>
    %c0_5 = arith.constant 0 : index
    %c0_6 = arith.constant 0 : index
    %7 = vector.load %arg4[%c0_5, %c0_6] : memref<32x16xf32, #tpu.memory_space<vmem>>, vector<32x16xf32>
    %cst = arith.constant dense<0.000000e+00> : vector<32x8xf32>
    %8 = tpu.matmul %7, %6, %cst {dimension_numbers = #tpu.dot_dimension_numbers<[1], [0], [0], [1], [0, 0, 1, 1], [], []>} : vector<32x16xf32>, vector<16x8xf32>, vector<32x8xf32> -> vector<32x8xf32>
    %c0_7 = arith.constant 0 : index
    %c0_8 = arith.constant 0 : index
    %9 = vector.load %arg5[%c0_7, %c0_8] : memref<32x1xf32, #tpu.memory_space<vmem>>, vector<32x1xf32>
    %10 = vector.broadcast %9 : vector<32x1xf32> to vector<32x8xf32>
    %11 = arith.addf %8, %10 : vector<32x8xf32>
    %cst_9 = arith.constant 0.000000e+00 : f32
    %12 = vector.broadcast %cst_9 : f32 to vector<32x8xf32>
    %13 = arith.maximumf %11, %12 : vector<32x8xf32>
    %c0_10 = arith.constant 0 : index
    %c0_11 = arith.constant 0 : index
    %14 = vector.load %arg6[%c0_10, %c0_11] : memref<32x8xf32, #tpu.memory_space<vmem>>, vector<32x8xf32>
    tpu.vector_store %arg6[%c0_10, %c0_11], %13 {strides = array<i32>} : memref<32x8xf32, #tpu.memory_space<vmem>>, vector<32x8xf32>,
    %c0_i32 = arith.constant 0 : i32
    %15 = arith.cmpi eq, %arg0, %c0_i32 : i32
    %16 = arith.extui %15 : i1 to i32
    %c0_i32_12 = arith.constant 0 : i32
    %17 = arith.cmpi ne, %16, %c0_i32_12 : i32
    scf.if %17 {
      %cst_23 = arith.constant 0.000000e+00 : f32
      %29 = vector.broadcast %cst_23 : f32 to vector<32x1xf32>
      %c0_24 = arith.constant 0 : index
      %c0_25 = arith.constant 0 : index
      %30 = vector.load %arg7[%c0_24, %c0_25] : memref<32x1xf32, #tpu.memory_space<vmem>>, vector<32x1xf32>
      tpu.vector_store %arg7[%c0_24, %c0_25], %29 {strides = array<i32>} : memref<32x1xf32, #tpu.memory_space<vmem>>, vector<32x1xf32>,
      %cst_26 = arith.constant 0.000000e+00 : f32
      %31 = vector.broadcast %cst_26 : f32 to vector<32x1xf32>
      %c0_27 = arith.constant 0 : index
      %c0_28 = arith.constant 0 : index
      %32 = vector.load %arg8[%c0_27, %c0_28] : memref<32x1xf32, #tpu.memory_space<vmem>>, vector<32x1xf32>
      tpu.vector_store %arg8[%c0_27, %c0_28], %31 {strides = array<i32>} : memref<32x1xf32, #tpu.memory_space<vmem>>, vector<32x1xf32>,
    } else {
    }
    %c0_13 = arith.constant 0 : index
    %c0_14 = arith.constant 0 : index
    %18 = vector.load %arg7[%c0_13, %c0_14] : memref<32x1xf32, #tpu.memory_space<vmem>>, vector<32x1xf32>
    %cst_15 = arith.constant dense<0.000000e+00> : vector<32xf32>
    %19 = vector.multi_reduction <add>, %13, %cst_15 [1] : vector<32x8xf32> to vector<32xf32>
    %20 = vector.shape_cast %19 : vector<32xf32> to vector<32x1xf32>
    %21 = arith.addf %18, %20 : vector<32x1xf32>
    %c0_16 = arith.constant 0 : index
    %c0_17 = arith.constant 0 : index
    %22 = vector.load %arg7[%c0_16, %c0_17] : memref<32x1xf32, #tpu.memory_space<vmem>>, vector<32x1xf32>
    tpu.vector_store %arg7[%c0_16, %c0_17], %21 {strides = array<i32>} : memref<32x1xf32, #tpu.memory_space<vmem>>, vector<32x1xf32>,
    %c0_18 = arith.constant 0 : index
    %c0_19 = arith.constant 0 : index
    %23 = vector.load %arg8[%c0_18, %c0_19] : memref<32x1xf32, #tpu.memory_space<vmem>>, vector<32x1xf32>
    %24 = arith.mulf %13, %13 : vector<32x8xf32>
    %cst_20 = arith.constant dense<0.000000e+00> : vector<32xf32>
    %25 = vector.multi_reduction <add>, %24, %cst_20 [1] : vector<32x8xf32> to vector<32xf32>
    %26 = vector.shape_cast %25 : vector<32xf32> to vector<32x1xf32>
    %27 = arith.addf %23, %26 : vector<32x1xf32>
    %c0_21 = arith.constant 0 : index
    %c0_22 = arith.constant 0 : index
    %28 = vector.load %arg8[%c0_21, %c0_22] : memref<32x1xf32, #tpu.memory_space<vmem>>, vector<32x1xf32>
    tpu.vector_store %arg8[%c0_21, %c0_22], %27 {strides = array<i32>} : memref<32x1xf32, #tpu.memory_space<vmem>>, vector<32x1xf32>,
    return
  }
  func.func @transform_0(%arg0: i32) -> (i32, i32) {
    %c0_i32 = arith.constant 0 : i32
    %c0_i32_0 = arith.constant 0 : i32
    %c0_i32_1 = arith.constant 0 : i32
    return %c0_i32, %c0_i32_0 : i32, i32
  }
  func.func @transform_1(%arg0: i32) -> (i32, i32) {
    %c0_i32 = arith.constant 0 : i32
    %c0_i32_0 = arith.constant 0 : i32
    %c0_i32_1 = arith.constant 0 : i32
    return %c0_i32, %c0_i32_0 : i32, i32
  }
  func.func @transform_2(%arg0: i32) -> (i32, i32) {
    %c0_i32 = arith.constant 0 : i32
    %c0_i32_0 = arith.constant 0 : i32
    return %c0_i32, %arg0 : i32, i32
  }
  func.func @transform_3(%arg0: i32) -> (i32, i32) {
    %c0_i32 = arith.constant 0 : i32
    %c0_i32_0 = arith.constant 0 : i32
    %c0_i32_1 = arith.constant 0 : i32
    return %c0_i32, %c0_i32_0 : i32, i32
  }
  func.func @transform_4(%arg0: i32) -> (i32, i32) {
    %c0_i32 = arith.constant 0 : i32
    %c0_i32_0 = arith.constant 0 : i32
    %c0_i32_1 = arith.constant 0 : i32
    return %c0_i32, %c0_i32_0 : i32, i32
  }
  func.func @transform_5(%arg0: i32) -> (i32, i32) {
    %c0_i32 = arith.constant 0 : i32
    %c0_i32_0 = arith.constant 0 : i32
    return %c0_i32, %arg0 : i32, i32
  }
  func.func @transform_6(%arg0: i32) -> (i32, i32) {
    %c0_i32 = arith.constant 0 : i32
    %c0_i32_0 = arith.constant 0 : i32
    %c0_i32_1 = arith.constant 0 : i32
    return %c0_i32, %c0_i32_0 : i32, i32
  }
  func.func @transform_7(%arg0: i32) -> (i32, i32) {
    %c0_i32 = arith.constant 0 : i32
    %c0_i32_0 = arith.constant 0 : i32
    %c0_i32_1 = arith.constant 0 : i32
    return %c0_i32, %c0_i32_0 : i32, i32
  }
}

module attributes {stable_mosaic.version = 11 : i64} {
  func.func @_layer_stats_kernel(%arg0: i32, %arg1: memref<32x1xf32, #tpu.memory_space<vmem>>, %arg2: memref<32x1xf32, #tpu.memory_space<vmem>>, %arg3: memref<32x8xf32, #tpu.memory_space<vmem>>, %arg4: memref<16x32xf32, #tpu.memory_space<vmem>>, %arg5: memref<16x1xf32, #tpu.memory_space<vmem>>, %arg6: memref<16x8xf32, #tpu.memory_space<vmem>>, %arg7: memref<16x1xf32, #tpu.memory_space<vmem>>, %arg8: memref<16x1xf32, #tpu.memory_space<vmem>>) attributes {dimension_semantics = [#tpu.dimension_semantics<arbitrary>], iteration_bounds = array<i64: 1>, scalar_prefetch = 0 : i64, scratch_operands = 0 : i64, tpu.core_type = #tpu.core_type<tc>, window_params = [{pipeline_mode = #tpu.pipeline_mode<synchronous>, transform_indices = @transform_0, window_bounds = array<i64: 32, 1>}, {pipeline_mode = #tpu.pipeline_mode<synchronous>, transform_indices = @transform_1, window_bounds = array<i64: 32, 1>}, {transform_indices = @transform_2, window_bounds = array<i64: 32, 8>}, {pipeline_mode = #tpu.pipeline_mode<synchronous>, transform_indices = @transform_3, window_bounds = array<i64: 16, 32>}, {pipeline_mode = #tpu.pipeline_mode<synchronous>, transform_indices = @transform_4, window_bounds = array<i64: 16, 1>}, {transform_indices = @transform_5, window_bounds = array<i64: 16, 8>}, {pipeline_mode = #tpu.pipeline_mode<synchronous>, transform_indices = @transform_6, window_bounds = array<i64: 16, 1>}, {pipeline_mode = #tpu.pipeline_mode<synchronous>, transform_indices = @transform_7, window_bounds = array<i64: 16, 1>}]} {
    %c0 = arith.constant 0 : index
    %c0_0 = arith.constant 0 : index
    %0 = vector.load %arg3[%c0, %c0_0] : memref<32x8xf32, #tpu.memory_space<vmem>>, vector<32x8xf32>
    %c0_1 = arith.constant 0 : index
    %c0_2 = arith.constant 0 : index
    %1 = vector.load %arg1[%c0_1, %c0_2] : memref<32x1xf32, #tpu.memory_space<vmem>>, vector<32x1xf32>
    %2 = vector.broadcast %1 : vector<32x1xf32> to vector<32x8xf32>
    %3 = arith.mulf %0, %2 : vector<32x8xf32>
    %c0_3 = arith.constant 0 : index
    %c0_4 = arith.constant 0 : index
    %4 = vector.load %arg2[%c0_3, %c0_4] : memref<32x1xf32, #tpu.memory_space<vmem>>, vector<32x1xf32>
    %5 = vector.broadcast %4 : vector<32x1xf32> to vector<32x8xf32>
    %6 = arith.addf %3, %5 : vector<32x8xf32>
    %c0_5 = arith.constant 0 : index
    %c0_6 = arith.constant 0 : index
    %7 = vector.load %arg4[%c0_5, %c0_6] : memref<16x32xf32, #tpu.memory_space<vmem>>, vector<16x32xf32>
    %cst = arith.constant dense<0.000000e+00> : vector<16x8xf32>
    %8 = tpu.matmul %7, %6, %cst {dimension_numbers = #tpu.dot_dimension_numbers<[1], [0], [0], [1], [0, 0, 1, 1], [], []>} : vector<16x32xf32>, vector<32x8xf32>, vector<16x8xf32> -> vector<16x8xf32>
    %c0_7 = arith.constant 0 : index
    %c0_8 = arith.constant 0 : index
    %9 = vector.load %arg5[%c0_7, %c0_8] : memref<16x1xf32, #tpu.memory_space<vmem>>, vector<16x1xf32>
    %10 = vector.broadcast %9 : vector<16x1xf32> to vector<16x8xf32>
    %11 = arith.addf %8, %10 : vector<16x8xf32>
    %cst_9 = arith.constant 0.000000e+00 : f32
    %12 = vector.broadcast %cst_9 : f32 to vector<16x8xf32>
    %13 = arith.maximumf %11, %12 : vector<16x8xf32>
    %c0_10 = arith.constant 0 : index
    %c0_11 = arith.constant 0 : index
    %14 = vector.load %arg6[%c0_10, %c0_11] : memref<16x8xf32, #tpu.memory_space<vmem>>, vector<16x8xf32>
    tpu.vector_store %arg6[%c0_10, %c0_11], %13 {strides = array<i32>} : memref<16x8xf32, #tpu.memory_space<vmem>>, vector<16x8xf32>,
    %c0_i32 = arith.constant 0 : i32
    %15 = arith.cmpi eq, %arg0, %c0_i32 : i32
    %16 = arith.extui %15 : i1 to i32
    %c0_i32_12 = arith.constant 0 : i32
    %17 = arith.cmpi ne, %16, %c0_i32_12 : i32
    scf.if %17 {
      %cst_23 = arith.constant 0.000000e+00 : f32
      %29 = vector.broadcast %cst_23 : f32 to vector<16x1xf32>
      %c0_24 = arith.constant 0 : index
      %c0_25 = arith.constant 0 : index
      %30 = vector.load %arg7[%c0_24, %c0_25] : memref<16x1xf32, #tpu.memory_space<vmem>>, vector<16x1xf32>
      tpu.vector_store %arg7[%c0_24, %c0_25], %29 {strides = array<i32>} : memref<16x1xf32, #tpu.memory_space<vmem>>, vector<16x1xf32>,
      %cst_26 = arith.constant 0.000000e+00 : f32
      %31 = vector.broadcast %cst_26 : f32 to vector<16x1xf32>
      %c0_27 = arith.constant 0 : index
      %c0_28 = arith.constant 0 : index
      %32 = vector.load %arg8[%c0_27, %c0_28] : memref<16x1xf32, #tpu.memory_space<vmem>>, vector<16x1xf32>
      tpu.vector_store %arg8[%c0_27, %c0_28], %31 {strides = array<i32>} : memref<16x1xf32, #tpu.memory_space<vmem>>, vector<16x1xf32>,
    } else {
    }
    %c0_13 = arith.constant 0 : index
    %c0_14 = arith.constant 0 : index
    %18 = vector.load %arg7[%c0_13, %c0_14] : memref<16x1xf32, #tpu.memory_space<vmem>>, vector<16x1xf32>
    %cst_15 = arith.constant dense<0.000000e+00> : vector<16xf32>
    %19 = vector.multi_reduction <add>, %13, %cst_15 [1] : vector<16x8xf32> to vector<16xf32>
    %20 = vector.shape_cast %19 : vector<16xf32> to vector<16x1xf32>
    %21 = arith.addf %18, %20 : vector<16x1xf32>
    %c0_16 = arith.constant 0 : index
    %c0_17 = arith.constant 0 : index
    %22 = vector.load %arg7[%c0_16, %c0_17] : memref<16x1xf32, #tpu.memory_space<vmem>>, vector<16x1xf32>
    tpu.vector_store %arg7[%c0_16, %c0_17], %21 {strides = array<i32>} : memref<16x1xf32, #tpu.memory_space<vmem>>, vector<16x1xf32>,
    %c0_18 = arith.constant 0 : index
    %c0_19 = arith.constant 0 : index
    %23 = vector.load %arg8[%c0_18, %c0_19] : memref<16x1xf32, #tpu.memory_space<vmem>>, vector<16x1xf32>
    %24 = arith.mulf %13, %13 : vector<16x8xf32>
    %cst_20 = arith.constant dense<0.000000e+00> : vector<16xf32>
    %25 = vector.multi_reduction <add>, %24, %cst_20 [1] : vector<16x8xf32> to vector<16xf32>
    %26 = vector.shape_cast %25 : vector<16xf32> to vector<16x1xf32>
    %27 = arith.addf %23, %26 : vector<16x1xf32>
    %c0_21 = arith.constant 0 : index
    %c0_22 = arith.constant 0 : index
    %28 = vector.load %arg8[%c0_21, %c0_22] : memref<16x1xf32, #tpu.memory_space<vmem>>, vector<16x1xf32>
    tpu.vector_store %arg8[%c0_21, %c0_22], %27 {strides = array<i32>} : memref<16x1xf32, #tpu.memory_space<vmem>>, vector<16x1xf32>,
    return
  }
  func.func @transform_0(%arg0: i32) -> (i32, i32) {
    %c0_i32 = arith.constant 0 : i32
    %c0_i32_0 = arith.constant 0 : i32
    %c0_i32_1 = arith.constant 0 : i32
    return %c0_i32, %c0_i32_0 : i32, i32
  }
  func.func @transform_1(%arg0: i32) -> (i32, i32) {
    %c0_i32 = arith.constant 0 : i32
    %c0_i32_0 = arith.constant 0 : i32
    %c0_i32_1 = arith.constant 0 : i32
    return %c0_i32, %c0_i32_0 : i32, i32
  }
  func.func @transform_2(%arg0: i32) -> (i32, i32) {
    %c0_i32 = arith.constant 0 : i32
    %c0_i32_0 = arith.constant 0 : i32
    return %c0_i32, %arg0 : i32, i32
  }
  func.func @transform_3(%arg0: i32) -> (i32, i32) {
    %c0_i32 = arith.constant 0 : i32
    %c0_i32_0 = arith.constant 0 : i32
    %c0_i32_1 = arith.constant 0 : i32
    return %c0_i32, %c0_i32_0 : i32, i32
  }
  func.func @transform_4(%arg0: i32) -> (i32, i32) {
    %c0_i32 = arith.constant 0 : i32
    %c0_i32_0 = arith.constant 0 : i32
    %c0_i32_1 = arith.constant 0 : i32
    return %c0_i32, %c0_i32_0 : i32, i32
  }
  func.func @transform_5(%arg0: i32) -> (i32, i32) {
    %c0_i32 = arith.constant 0 : i32
    %c0_i32_0 = arith.constant 0 : i32
    return %c0_i32, %arg0 : i32, i32
  }
  func.func @transform_6(%arg0: i32) -> (i32, i32) {
    %c0_i32 = arith.constant 0 : i32
    %c0_i32_0 = arith.constant 0 : i32
    %c0_i32_1 = arith.constant 0 : i32
    return %c0_i32, %c0_i32_0 : i32, i32
  }
  func.func @transform_7(%arg0: i32) -> (i32, i32) {
    %c0_i32 = arith.constant 0 : i32
    %c0_i32_0 = arith.constant 0 : i32
    %c0_i32_1 = arith.constant 0 : i32
    return %c0_i32, %c0_i32_0 : i32, i32
  }
}

module attributes {stable_mosaic.version = 11 : i64} {
  func.func @_layer_stats_kernel(%arg0: i32, %arg1: memref<16x1xf32, #tpu.memory_space<vmem>>, %arg2: memref<16x1xf32, #tpu.memory_space<vmem>>, %arg3: memref<16x8xf32, #tpu.memory_space<vmem>>, %arg4: memref<8x16xf32, #tpu.memory_space<vmem>>, %arg5: memref<8x1xf32, #tpu.memory_space<vmem>>, %arg6: memref<8x8xf32, #tpu.memory_space<vmem>>, %arg7: memref<8x1xf32, #tpu.memory_space<vmem>>, %arg8: memref<8x1xf32, #tpu.memory_space<vmem>>) attributes {dimension_semantics = [#tpu.dimension_semantics<arbitrary>], iteration_bounds = array<i64: 1>, scalar_prefetch = 0 : i64, scratch_operands = 0 : i64, tpu.core_type = #tpu.core_type<tc>, window_params = [{pipeline_mode = #tpu.pipeline_mode<synchronous>, transform_indices = @transform_0, window_bounds = array<i64: 16, 1>}, {pipeline_mode = #tpu.pipeline_mode<synchronous>, transform_indices = @transform_1, window_bounds = array<i64: 16, 1>}, {transform_indices = @transform_2, window_bounds = array<i64: 16, 8>}, {pipeline_mode = #tpu.pipeline_mode<synchronous>, transform_indices = @transform_3, window_bounds = array<i64: 8, 16>}, {pipeline_mode = #tpu.pipeline_mode<synchronous>, transform_indices = @transform_4, window_bounds = array<i64: 8, 1>}, {transform_indices = @transform_5, window_bounds = array<i64: 8, 8>}, {pipeline_mode = #tpu.pipeline_mode<synchronous>, transform_indices = @transform_6, window_bounds = array<i64: 8, 1>}, {pipeline_mode = #tpu.pipeline_mode<synchronous>, transform_indices = @transform_7, window_bounds = array<i64: 8, 1>}]} {
    %c0 = arith.constant 0 : index
    %c0_0 = arith.constant 0 : index
    %0 = vector.load %arg3[%c0, %c0_0] : memref<16x8xf32, #tpu.memory_space<vmem>>, vector<16x8xf32>
    %c0_1 = arith.constant 0 : index
    %c0_2 = arith.constant 0 : index
    %1 = vector.load %arg1[%c0_1, %c0_2] : memref<16x1xf32, #tpu.memory_space<vmem>>, vector<16x1xf32>
    %2 = vector.broadcast %1 : vector<16x1xf32> to vector<16x8xf32>
    %3 = arith.mulf %0, %2 : vector<16x8xf32>
    %c0_3 = arith.constant 0 : index
    %c0_4 = arith.constant 0 : index
    %4 = vector.load %arg2[%c0_3, %c0_4] : memref<16x1xf32, #tpu.memory_space<vmem>>, vector<16x1xf32>
    %5 = vector.broadcast %4 : vector<16x1xf32> to vector<16x8xf32>
    %6 = arith.addf %3, %5 : vector<16x8xf32>
    %c0_5 = arith.constant 0 : index
    %c0_6 = arith.constant 0 : index
    %7 = vector.load %arg4[%c0_5, %c0_6] : memref<8x16xf32, #tpu.memory_space<vmem>>, vector<8x16xf32>
    %cst = arith.constant dense<0.000000e+00> : vector<8x8xf32>
    %8 = tpu.matmul %7, %6, %cst {dimension_numbers = #tpu.dot_dimension_numbers<[1], [0], [0], [1], [0, 0, 1, 1], [], []>} : vector<8x16xf32>, vector<16x8xf32>, vector<8x8xf32> -> vector<8x8xf32>
    %c0_7 = arith.constant 0 : index
    %c0_8 = arith.constant 0 : index
    %9 = vector.load %arg5[%c0_7, %c0_8] : memref<8x1xf32, #tpu.memory_space<vmem>>, vector<8x1xf32>
    %10 = vector.broadcast %9 : vector<8x1xf32> to vector<8x8xf32>
    %11 = arith.addf %8, %10 : vector<8x8xf32>
    %cst_9 = arith.constant 0.000000e+00 : f32
    %12 = vector.broadcast %cst_9 : f32 to vector<8x8xf32>
    %13 = arith.maximumf %11, %12 : vector<8x8xf32>
    %c0_10 = arith.constant 0 : index
    %c0_11 = arith.constant 0 : index
    %14 = vector.load %arg6[%c0_10, %c0_11] : memref<8x8xf32, #tpu.memory_space<vmem>>, vector<8x8xf32>
    tpu.vector_store %arg6[%c0_10, %c0_11], %13 {strides = array<i32>} : memref<8x8xf32, #tpu.memory_space<vmem>>, vector<8x8xf32>,
    %c0_i32 = arith.constant 0 : i32
    %15 = arith.cmpi eq, %arg0, %c0_i32 : i32
    %16 = arith.extui %15 : i1 to i32
    %c0_i32_12 = arith.constant 0 : i32
    %17 = arith.cmpi ne, %16, %c0_i32_12 : i32
    scf.if %17 {
      %cst_23 = arith.constant 0.000000e+00 : f32
      %29 = vector.broadcast %cst_23 : f32 to vector<8x1xf32>
      %c0_24 = arith.constant 0 : index
      %c0_25 = arith.constant 0 : index
      %30 = vector.load %arg7[%c0_24, %c0_25] : memref<8x1xf32, #tpu.memory_space<vmem>>, vector<8x1xf32>
      tpu.vector_store %arg7[%c0_24, %c0_25], %29 {strides = array<i32>} : memref<8x1xf32, #tpu.memory_space<vmem>>, vector<8x1xf32>,
      %cst_26 = arith.constant 0.000000e+00 : f32
      %31 = vector.broadcast %cst_26 : f32 to vector<8x1xf32>
      %c0_27 = arith.constant 0 : index
      %c0_28 = arith.constant 0 : index
      %32 = vector.load %arg8[%c0_27, %c0_28] : memref<8x1xf32, #tpu.memory_space<vmem>>, vector<8x1xf32>
      tpu.vector_store %arg8[%c0_27, %c0_28], %31 {strides = array<i32>} : memref<8x1xf32, #tpu.memory_space<vmem>>, vector<8x1xf32>,
    } else {
    }
    %c0_13 = arith.constant 0 : index
    %c0_14 = arith.constant 0 : index
    %18 = vector.load %arg7[%c0_13, %c0_14] : memref<8x1xf32, #tpu.memory_space<vmem>>, vector<8x1xf32>
    %cst_15 = arith.constant dense<0.000000e+00> : vector<8xf32>
    %19 = vector.multi_reduction <add>, %13, %cst_15 [1] : vector<8x8xf32> to vector<8xf32>
    %20 = vector.shape_cast %19 : vector<8xf32> to vector<8x1xf32>
    %21 = arith.addf %18, %20 : vector<8x1xf32>
    %c0_16 = arith.constant 0 : index
    %c0_17 = arith.constant 0 : index
    %22 = vector.load %arg7[%c0_16, %c0_17] : memref<8x1xf32, #tpu.memory_space<vmem>>, vector<8x1xf32>
    tpu.vector_store %arg7[%c0_16, %c0_17], %21 {strides = array<i32>} : memref<8x1xf32, #tpu.memory_space<vmem>>, vector<8x1xf32>,
    %c0_18 = arith.constant 0 : index
    %c0_19 = arith.constant 0 : index
    %23 = vector.load %arg8[%c0_18, %c0_19] : memref<8x1xf32, #tpu.memory_space<vmem>>, vector<8x1xf32>
    %24 = arith.mulf %13, %13 : vector<8x8xf32>
    %cst_20 = arith.constant dense<0.000000e+00> : vector<8xf32>
    %25 = vector.multi_reduction <add>, %24, %cst_20 [1] : vector<8x8xf32> to vector<8xf32>
    %26 = vector.shape_cast %25 : vector<8xf32> to vector<8x1xf32>
    %27 = arith.addf %23, %26 : vector<8x1xf32>
    %c0_21 = arith.constant 0 : index
    %c0_22 = arith.constant 0 : index
    %28 = vector.load %arg8[%c0_21, %c0_22] : memref<8x1xf32, #tpu.memory_space<vmem>>, vector<8x1xf32>
    tpu.vector_store %arg8[%c0_21, %c0_22], %27 {strides = array<i32>} : memref<8x1xf32, #tpu.memory_space<vmem>>, vector<8x1xf32>,
    return
  }
  func.func @transform_0(%arg0: i32) -> (i32, i32) {
    %c0_i32 = arith.constant 0 : i32
    %c0_i32_0 = arith.constant 0 : i32
    %c0_i32_1 = arith.constant 0 : i32
    return %c0_i32, %c0_i32_0 : i32, i32
  }
  func.func @transform_1(%arg0: i32) -> (i32, i32) {
    %c0_i32 = arith.constant 0 : i32
    %c0_i32_0 = arith.constant 0 : i32
    %c0_i32_1 = arith.constant 0 : i32
    return %c0_i32, %c0_i32_0 : i32, i32
  }
  func.func @transform_2(%arg0: i32) -> (i32, i32) {
    %c0_i32 = arith.constant 0 : i32
    %c0_i32_0 = arith.constant 0 : i32
    return %c0_i32, %arg0 : i32, i32
  }
  func.func @transform_3(%arg0: i32) -> (i32, i32) {
    %c0_i32 = arith.constant 0 : i32
    %c0_i32_0 = arith.constant 0 : i32
    %c0_i32_1 = arith.constant 0 : i32
    return %c0_i32, %c0_i32_0 : i32, i32
  }
  func.func @transform_4(%arg0: i32) -> (i32, i32) {
    %c0_i32 = arith.constant 0 : i32
    %c0_i32_0 = arith.constant 0 : i32
    %c0_i32_1 = arith.constant 0 : i32
    return %c0_i32, %c0_i32_0 : i32, i32
  }
  func.func @transform_5(%arg0: i32) -> (i32, i32) {
    %c0_i32 = arith.constant 0 : i32
    %c0_i32_0 = arith.constant 0 : i32
    return %c0_i32, %arg0 : i32, i32
  }
  func.func @transform_6(%arg0: i32) -> (i32, i32) {
    %c0_i32 = arith.constant 0 : i32
    %c0_i32_0 = arith.constant 0 : i32
    %c0_i32_1 = arith.constant 0 : i32
    return %c0_i32, %c0_i32_0 : i32, i32
  }
  func.func @transform_7(%arg0: i32) -> (i32, i32) {
    %c0_i32 = arith.constant 0 : i32
    %c0_i32_0 = arith.constant 0 : i32
    %c0_i32_1 = arith.constant 0 : i32
    return %c0_i32, %c0_i32_0 : i32, i32
  }
}

module attributes {stable_mosaic.version = 11 : i64} {
  func.func @_layer_final_kernel(%arg0: i32, %arg1: memref<8x1xf32, #tpu.memory_space<vmem>>, %arg2: memref<8x1xf32, #tpu.memory_space<vmem>>, %arg3: memref<8x8xf32, #tpu.memory_space<vmem>>, %arg4: memref<4x8xf32, #tpu.memory_space<vmem>>, %arg5: memref<4x1xf32, #tpu.memory_space<vmem>>, %arg6: memref<4x8xf32, #tpu.memory_space<vmem>>) attributes {dimension_semantics = [#tpu.dimension_semantics<parallel>], iteration_bounds = array<i64: 1>, scalar_prefetch = 0 : i64, scratch_operands = 0 : i64, tpu.core_type = #tpu.core_type<tc>, window_params = [{pipeline_mode = #tpu.pipeline_mode<synchronous>, transform_indices = @transform_0, window_bounds = array<i64: 8, 1>}, {pipeline_mode = #tpu.pipeline_mode<synchronous>, transform_indices = @transform_1, window_bounds = array<i64: 8, 1>}, {transform_indices = @transform_2, window_bounds = array<i64: 8, 8>}, {pipeline_mode = #tpu.pipeline_mode<synchronous>, transform_indices = @transform_3, window_bounds = array<i64: 4, 8>}, {pipeline_mode = #tpu.pipeline_mode<synchronous>, transform_indices = @transform_4, window_bounds = array<i64: 4, 1>}, {transform_indices = @transform_5, window_bounds = array<i64: 4, 8>}]} {
    %c0 = arith.constant 0 : index
    %c0_0 = arith.constant 0 : index
    %0 = vector.load %arg3[%c0, %c0_0] : memref<8x8xf32, #tpu.memory_space<vmem>>, vector<8x8xf32>
    %c0_1 = arith.constant 0 : index
    %c0_2 = arith.constant 0 : index
    %1 = vector.load %arg1[%c0_1, %c0_2] : memref<8x1xf32, #tpu.memory_space<vmem>>, vector<8x1xf32>
    %2 = vector.broadcast %1 : vector<8x1xf32> to vector<8x8xf32>
    %3 = arith.mulf %0, %2 : vector<8x8xf32>
    %c0_3 = arith.constant 0 : index
    %c0_4 = arith.constant 0 : index
    %4 = vector.load %arg2[%c0_3, %c0_4] : memref<8x1xf32, #tpu.memory_space<vmem>>, vector<8x1xf32>
    %5 = vector.broadcast %4 : vector<8x1xf32> to vector<8x8xf32>
    %6 = arith.addf %3, %5 : vector<8x8xf32>
    %c0_5 = arith.constant 0 : index
    %c0_6 = arith.constant 0 : index
    %7 = vector.load %arg4[%c0_5, %c0_6] : memref<4x8xf32, #tpu.memory_space<vmem>>, vector<4x8xf32>
    %cst = arith.constant dense<0.000000e+00> : vector<4x8xf32>
    %8 = tpu.matmul %7, %6, %cst {dimension_numbers = #tpu.dot_dimension_numbers<[1], [0], [0], [1], [0, 0, 1, 1], [], []>} : vector<4x8xf32>, vector<8x8xf32>, vector<4x8xf32> -> vector<4x8xf32>
    %c0_7 = arith.constant 0 : index
    %c0_8 = arith.constant 0 : index
    %9 = vector.load %arg5[%c0_7, %c0_8] : memref<4x1xf32, #tpu.memory_space<vmem>>, vector<4x1xf32>
    %10 = vector.broadcast %9 : vector<4x1xf32> to vector<4x8xf32>
    %11 = arith.addf %8, %10 : vector<4x8xf32>
    %cst_9 = arith.constant 0.000000e+00 : f32
    %12 = vector.broadcast %cst_9 : f32 to vector<4x8xf32>
    %13 = arith.maximumf %11, %12 : vector<4x8xf32>
    %c0_10 = arith.constant 0 : index
    %c0_11 = arith.constant 0 : index
    %14 = vector.load %arg6[%c0_10, %c0_11] : memref<4x8xf32, #tpu.memory_space<vmem>>, vector<4x8xf32>
    tpu.vector_store %arg6[%c0_10, %c0_11], %13 {strides = array<i32>} : memref<4x8xf32, #tpu.memory_space<vmem>>, vector<4x8xf32>,
    return
  }
  func.func @transform_0(%arg0: i32) -> (i32, i32) {
    %c0_i32 = arith.constant 0 : i32
    %c0_i32_0 = arith.constant 0 : i32
    %c0_i32_1 = arith.constant 0 : i32
    return %c0_i32, %c0_i32_0 : i32, i32
  }
  func.func @transform_1(%arg0: i32) -> (i32, i32) {
    %c0_i32 = arith.constant 0 : i32
    %c0_i32_0 = arith.constant 0 : i32
    %c0_i32_1 = arith.constant 0 : i32
    return %c0_i32, %c0_i32_0 : i32, i32
  }
  func.func @transform_2(%arg0: i32) -> (i32, i32) {
    %c0_i32 = arith.constant 0 : i32
    %c0_i32_0 = arith.constant 0 : i32
    return %c0_i32, %arg0 : i32, i32
  }
  func.func @transform_3(%arg0: i32) -> (i32, i32) {
    %c0_i32 = arith.constant 0 : i32
    %c0_i32_0 = arith.constant 0 : i32
    %c0_i32_1 = arith.constant 0 : i32
    return %c0_i32, %c0_i32_0 : i32, i32
  }
  func.func @transform_4(%arg0: i32) -> (i32, i32) {
    %c0_i32 = arith.constant 0 : i32
    %c0_i32_0 = arith.constant 0 : i32
    %c0_i32_1 = arith.constant 0 : i32
    return %c0_i32, %c0_i32_0 : i32, i32
  }
  func.func @transform_5(%arg0: i32) -> (i32, i32) {
    %c0_i32 = arith.constant 0 : i32
    %c0_i32_0 = arith.constant 0 : i32
    return %c0_i32, %arg0 : i32, i32
  }
}

</mosaic_0001>

<bundles_post_ra>
// kernel: network_forward.5
= control target key start
LH: loop header
LB: loop body
LE: loop exit
PB: predicated region body
PF: predicated region fallthrough
CT: control target
= control target key end

     0   :  { %v191_v0 = vmov 0   ;;  %vm97_vm0 = vcmask 261120   ;;  %vm136_vm1 = vcmask 7168   ;;  %v192_v33 = vmov 0.0   ;;  %s331_s1 = inlined_call_operand.vmem [shape: f32[32,1], index: 1, kind: input, shape index: {}]   ;;  %s332_s0 = inlined_call_operand.vmem [shape: f32[32,1], index: 0, kind: input, shape index: {}]   ;;  %s333_s4 = inlined_call_operand.vmem [shape: f32[16,1], index: 4, kind: input, shape index: {}]   ;;  %s334_s2 = inlined_call_operand.vmem [shape: f32[32,8], index: 2, kind: input, shape index: {}]   ;;  %s335_s3 = inlined_call_operand.vmem [shape: f32[16,32], index: 3, kind: input, shape index: {}]   ;;  %s336_s6 = inlined_call_operand.vmem [shape: f32[16,1], index: 6, kind: output, shape index: {1}]   ;;  %s337_s7 = inlined_call_operand.vmem [shape: f32[16,1], index: 7, kind: output, shape index: {2}]   ;;  %s338_s5 = inlined_call_operand.vmem [shape: f32[16,8], index: 5, kind: output, shape index: {0}]  }
   0x1   :  { %189 = vset.pattern.permute.xlu1 %v191_v0  ;;  %188 = vset.pattern.permute.xlu0 %v191_v0  ;;  %v58_v1 = vld [vmem:[%s331_s1 + $0x18] sm:$0xff]  ;;  %v57_v3 = vld [vmem:[%s331_s1 + $0x10] sm:$0xff]  ;;  %v28_v5 = vld [vmem:[%s332_s0 + $0x8] sm:$0xff]  ;;  %137 = vst.msk [vmem:[%s336_s6] sm:$0xff] %vm136_vm1, %v192_v33  ;;  %vm129_vm2 = vcmask 64512  }
   0x2   :  { %v30_v2 = vld [vmem:[%s332_s0 + $0x18] sm:$0xff]  ;;  %76 = vperm.xlu1 %189, %v58_v1   ;;  %190 = vset.pattern.permute.xlu2 %v191_v0  ;;  %v29_v4 = vld [vmem:[%s332_s0 + $0x10] sm:$0xff]  ;;  %v27_v6 = vld [vmem:[%s332_s0] sm:$0xff]  ;;  %138 = vst.msk [vmem:[%s336_s6 + $0x8] sm:$0xff] %vm136_vm1, %v192_v33 }
   0x3   :  { %48 = vperm.xlu0 %188, %v30_v2   ;;  %71 = vperm.xlu2 %190, %v57_v3   ;;  %v56_v7 = vld [vmem:[%s331_s1 + $0x8] sm:$0xff]  ;;  %v55_v8 = vld [vmem:[%s331_s1] sm:$0xff]  ;;  %v26_v11 = vld [vmem:[%s334_s2 + $0x18] sm:$0xff]  ;;  %139 = vst.msk [vmem:[%s337_s7] sm:$0xff] %vm136_vm1, %v192_v33 }
   0x4   :  { %v85_v9 = vld [vmem:[%s333_s4] sm:$0xff]  ;;  %v86_v10 = vld [vmem:[%s333_s4 + $0x8] sm:$0xff]  ;;  %v25_v17 = vld [vmem:[%s334_s2 + $0x10] sm:$0xff]  ;;  %140 = vst.msk [vmem:[%s337_s7 + $0x8] sm:$0xff] %vm136_vm1, %v192_v33 }
   0x5   :  { %v24_v22 = vld [vmem:[%s334_s2 + $0x8] sm:$0xff]  ;;  %v23_v23 = vld [vmem:[%s334_s2] sm:$0xff] }
   0x6   :  { %v83_v31 = vld [vmem:[%s335_s3] sm:$0xff]  ;;  %v84_v32 = vld [vmem:[%s335_s3 + $0x8] sm:$0xff] }
   0x8   :  { %v141_v48 = vld [vmem:[%s336_s6] sm:$0xff] }
   0x9   :  { %v142_v49 = vld [vmem:[%s336_s6 + $0x8] sm:$0xff] }
   0xa   :  { %38 = vperm.xlu1 %189, %v28_v5   ;;  %v154_v52 = vld [vmem:[%s337_s7] sm:$0xff] }
   0xb   :  { %43 = vperm.xlu0 %188, %v29_v4   ;;  %33 = vperm.xlu2 %190, %v27_v6   ;;  %v155_v57 = vld [vmem:[%s337_s7 + $0x8] sm:$0xff] }
  0x12   :  { %61 = vperm.xlu1 %189, %v55_v8  }
  0x13   :  { %66 = vperm.xlu0 %188, %v56_v7   ;;  %89 = vperm.xlu2 %190, %v85_v9  }
  0x1b   :  { %94 = vperm.xlu0 %188, %v86_v10  }
  0x5d   :  { %v72_v16 = vpop.permute.xlu2 %71 }
  0x65   :  { %v34_v24 = vpop.permute.xlu2 %33 }
  0x66   :  { %v51_v28 = vmul.f32 %v34_v24, %v23_v23 }
  0x6d   :  { %v90_v34 = vpop.permute.xlu2 %89 }
  0x74   :  { %v77_v12 = vpop.permute.xlu1 %76 }
  0x75   :  { %v49_v13 = vpop.permute.xlu0 %48 }
  0x76   :  { %v54_v14 = vmul.f32 %v49_v13, %v26_v11 }
  0x78   :  { %v82_v15 = vadd.f32 %v77_v12, %v54_v14 }
  0x7a   :  { %116 = vmatpush.msra.mxu0 %v82_v15  ;;  %182 = vmatpush.msra.mxu1 %v82_v15 }
  0x7c   :  { %v39_v19 = vpop.permute.xlu1 %38 }
  0x7d   :  { %v44_v18 = vpop.permute.xlu0 %43  ;;  %v52_v25 = vmul.f32 %v39_v19, %v24_v22 }
  0x7e   :  { %v53_v20 = vmul.f32 %v44_v18, %v25_v17 }
  0x80   :  { %v81_v21 = vadd.f32 %v72_v16, %v53_v20 }
  0x82   :  { %117 = vmatpush.msra.mxu0 %v81_v21  ;;  %183 = vmatpush.msra.mxu1 %v81_v21 }
  0x84   :  { %v62_v27 = vpop.permute.xlu1 %61 }
  0x85   :  { %v67_v26 = vpop.permute.xlu0 %66  ;;  %v79_v30 = vadd.f32 %v62_v27, %v51_v28 }
  0x86   :  { %v80_v29 = vadd.f32 %v67_v26, %v52_v25 }
  0x88   :  { %118 = vmatpush.msra.mxu0 %v80_v29  ;;  %184 = vmatpush.msra.mxu1 %v80_v29 }
  0x8a   :  { %119 = vmatpush.msra.mxu0 %v79_v30  ;;  %185 = vmatpush.msra.mxu1 %v79_v30 }
  0x8b   :  { %180 = vmatmul.msk.f32.vlgmr.msra.gmra.mxu0 %vm97_vm0, %v83_v31  ;;  %181 = vmatmul.msk.f32.vlgmr.msra.gmra.mxu1 %vm97_vm0, %v84_v32 }
  0x8d   :  { %v95_v35 = vpop.permute.xlu0 %94 }
 0x108   :  { %v121_v36 = vpop.f32.mrf.mxu0  ;;  %v124_v37 = vpop.f32.mrf.mxu1 }
 0x109   :  { %v122_v38 = vadd.f32 %v121_v36, %v90_v34  ;;  %v125_v39 = vadd.f32 %v124_v37, %v95_v35 }
 0x10b   :  { %v127_v40 = vmax.f32 %v122_v38, 0.0  ;;  %v128_v41 = vmax.f32 %v125_v39, 0.0 }
 0x10d   :  { %130 = vst.msk [vmem:[%s338_s5] sm:$0xff] %vm129_vm2, %v127_v40  ;;  %v146_v42 = vsel %vm129_vm2, %v128_v41, 0.0  ;;  %v143_v43 = vsel %vm129_vm2, %v127_v40, 0.0  ;;  %v156_v44 = vmul.f32 %v127_v40, %v127_v40  ;;  %v157_v46 = vmul.f32 %v128_v41, %v128_v41 }
 0x10e   :  { %131 = vst.msk [vmem:[%s338_s5 + $0x8] sm:$0xff] %vm129_vm2, %v128_v41  ;;  %147 = vadd.xlane.f32.xlu2 %v146_v42  ;;  %144 = vadd.xlane.f32.xlu1 %v143_v43 }
 0x10f   :  { %v158_v45 = vsel %vm129_vm2, %v156_v44, 0.0  ;;  %v161_v47 = vsel %vm129_vm2, %v157_v46, 0.0 }
 0x110   :  { %159 = vadd.xlane.f32.xlu0 %v158_v45 }
 0x116   :  { %162 = vadd.xlane.f32.xlu2 %v161_v47 }
 0x181   :  { %v145_v50 = vpop.xlane.xlu1 %144  ;;  %v148_v51 = vpop.xlane.xlu2 %147 }
 0x182   :  { %v149_v53 = vadd.f32 %v145_v50, %v141_v48  ;;  %v150_v54 = vadd.f32 %v148_v51, %v142_v49 }
 0x183   :  { %v160_v55 = vpop.xlane.xlu0 %159 }
 0x184   :  { %152 = vst.msk [vmem:[%s336_s6] sm:$0xff] %vm136_vm1, %v149_v53  ;;  %v164_v56 = vadd.f32 %v160_v55, %v154_v52 }
 0x185   :  { %153 = vst.msk [vmem:[%s336_s6 + $0x8] sm:$0xff] %vm136_vm1, %v150_v54 }
 0x186   :  { %166 = vst.msk [vmem:[%s337_s7] sm:$0xff] %vm136_vm1, %v164_v56 }
 0x189   :  { %v163_v58 = vpop.xlane.xlu2 %162 }
 0x18a   :  { %v165_v59 = vadd.f32 %v163_v58, %v155_v57 }
 0x18c   :  { %167 = vst.msk [vmem:[%s337_s7 + $0x8] sm:$0xff] %vm136_vm1, %v165_v59 }

// kernel: network_forward.4
= control target key start
LH: loop header
LB: loop body
LE: loop exit
PB: predicated region body
PF: predicated region fallthrough
CT: control target
= control target key end

     0   :  { %v225_v0 = vmov 0   ;;  %vm81_vm0 = vcmask 130048   ;;  %vm136_vm1 = vcmask 7168   ;;  %v226_v25 = vmov 0.0   ;;  %s421_s1 = inlined_call_operand.vmem [shape: f32[16,1], index: 1, kind: input, shape index: {}]   ;;  %s422_s0 = inlined_call_operand.vmem [shape: f32[16,1], index: 0, kind: input, shape index: {}]   ;;  %s423_s4 = inlined_call_operand.vmem [shape: f32[32,1], index: 4, kind: input, shape index: {}]   ;;  %s424_s2 = inlined_call_operand.vmem [shape: f32[16,8], index: 2, kind: input, shape index: {}]   ;;  %s425_s3 = inlined_call_operand.vmem [shape: f32[32,16], index: 3, kind: input, shape index: {}]   ;;  %s426_s6 = inlined_call_operand.vmem [shape: f32[32,1], index: 6, kind: output, shape index: {1}]   ;;  %s427_s7 = inlined_call_operand.vmem [shape: f32[32,1], index: 7, kind: output, shape index: {2}]   ;;  %s428_s5 = inlined_call_operand.vmem [shape: f32[32,8], index: 5, kind: output, shape index: {0}]  }
   0x1   :  { %223 = vset.pattern.permute.xlu1 %v225_v0  ;;  %222 = vset.pattern.permute.xlu0 %v225_v0  ;;  %v40_v1 = vld [vmem:[%s421_s1 + $0x8] sm:$0xff]  ;;  %v39_v3 = vld [vmem:[%s421_s1] sm:$0xff]  ;;  %v60_v5 = vld [vmem:[%s423_s4 + $0x18] sm:$0xff]  ;;  %137 = vst.msk [vmem:[%s426_s6] sm:$0xff] %vm136_vm1, %v226_v25  ;;  %vm127_vm2 = vcmask 64512  }
   0x2   :  { %v26_v2 = vld [vmem:[%s422_s0 + $0x8] sm:$0xff]  ;;  %48 = vperm.xlu1 %223, %v40_v1   ;;  %224 = vset.pattern.permute.xlu2 %v225_v0  ;;  %v25_v4 = vld [vmem:[%s422_s0] sm:$0xff]  ;;  %v59_v6 = vld [vmem:[%s423_s4 + $0x10] sm:$0xff]  ;;  %138 = vst.msk [vmem:[%s426_s6 + $0x8] sm:$0xff] %vm136_vm1, %v226_v25 }
   0x3   :  { %34 = vperm.xlu0 %222, %v26_v2   ;;  %v57_v7 = vld [vmem:[%s423_s4] sm:$0xff]  ;;  %v58_v8 = vld [vmem:[%s423_s4 + $0x8] sm:$0xff]  ;;  %v55_v21 = vld [vmem:[%s425_s3 + $0x10] sm:$0xff]  ;;  %139 = vst.msk [vmem:[%s426_s6 + $0x10] sm:$0xff] %vm136_vm1, %v226_v25 }
   0x4   :  { %63 = vperm.xlu2 %224, %v57_v7   ;;  %v24_v9 = vld [vmem:[%s424_s2 + $0x8] sm:$0xff]  ;;  %v23_v14 = vld [vmem:[%s424_s2] sm:$0xff]  ;;  %v56_v22 = vld [vmem:[%s425_s3 + $0x18] sm:$0xff]  ;;  %140 = vst.msk [vmem:[%s426_s6 + $0x18] sm:$0xff] %vm136_vm1, %v226_v25 }
   0x5   :  { %v53_v19 = vld [vmem:[%s425_s3] sm:$0xff]  ;;  %v54_v20 = vld [vmem:[%s425_s3 + $0x8] sm:$0xff]  ;;  %141 = vst.msk [vmem:[%s427_s7] sm:$0xff] %vm136_vm1, %v226_v25 }
   0x6   :  { %142 = vst.msk [vmem:[%s427_s7 + $0x8] sm:$0xff] %vm136_vm1, %v226_v25 }
   0x7   :  { %143 = vst.msk [vmem:[%s427_s7 + $0x10] sm:$0xff] %vm136_vm1, %v226_v25 }
   0x8   :  { %144 = vst.msk [vmem:[%s427_s7 + $0x18] sm:$0xff] %vm136_vm1, %v226_v25  ;;  %v145_v52 = vld [vmem:[%s426_s6] sm:$0xff] }
   0x9   :  { %v146_v53 = vld [vmem:[%s426_s6 + $0x8] sm:$0xff] }
   0xa   :  { %43 = vperm.xlu1 %223, %v39_v3   ;;  %v147_v58 = vld [vmem:[%s426_s6 + $0x10] sm:$0xff] }
   0xb   :  { %29 = vperm.xlu0 %222, %v25_v4   ;;  %v148_v4 = vld [vmem:[%s426_s6 + $0x18] sm:$0xff] }
   0xc   :  { %68 = vperm.xlu2 %224, %v58_v8   ;;  %v170_v59 = vld [vmem:[%s427_s7] sm:$0xff] }
   0xd   :  { %v171_v60 = vld [vmem:[%s427_s7 + $0x8] sm:$0xff] }
   0xe   :  { %v172_v3 = vld [vmem:[%s427_s7 + $0x10] sm:$0xff] }
  0x12   :  { %78 = vperm.xlu1 %223, %v60_v5  }
  0x13   :  { %73 = vperm.xlu0 %222, %v59_v6  }
  0x5e   :  { %v64_v23 = vpop.permute.xlu2 %63 }
  0x66   :  { %v69_v24 = vpop.permute.xlu2 %68 }
  0x74   :  { %v49_v10 = vpop.permute.xlu1 %48 }
  0x75   :  { %v35_v11 = vpop.permute.xlu0 %34 }
  0x76   :  { %v38_v12 = vmul.f32 %v35_v11, %v24_v9  ;;  %v173_v9 = vld [vmem:[%s427_s7 + $0x18] sm:$0xff] }
  0x78   :  { %v52_v13 = vadd.f32 %v49_v10, %v38_v12 }
  0x7a   :  { %108 = vmatpush.msra.mxu0 %v52_v13  ;;  %214 = vmatpush.msra.mxu1 %v52_v13 }
  0x7b   :  { %215 = vmatpush.msra.mxu2 %v52_v13  ;;  %216 = vmatpush.msra.mxu3 %v52_v13 }
  0x7c   :  { %v44_v17 = vpop.permute.xlu1 %43 }
  0x7d   :  { %v30_v15 = vpop.permute.xlu0 %29 }
  0x7e   :  { %v37_v16 = vmul.f32 %v30_v15, %v23_v14 }
  0x80   :  { %v51_v18 = vadd.f32 %v44_v17, %v37_v16 }
  0x82   :  { %109 = vmatpush.msra.mxu0 %v51_v18  ;;  %217 = vmatpush.msra.mxu1 %v51_v18 }
  0x83   :  { %218 = vmatpush.msra.mxu2 %v51_v18  ;;  %219 = vmatpush.msra.mxu3 %v51_v18 }
  0x84   :  { %210 = vmatmul.msk.f32.vlgmr.msra.gmra.mxu0 %vm81_vm0, %v53_v19  ;;  %211 = vmatmul.msk.f32.vlgmr.msra.gmra.mxu1 %vm81_vm0, %v54_v20  ;;  %v79_v34 = vpop.permute.xlu1 %78 }
  0x85   :  { %212 = vmatmul.msk.f32.vlgmr.msra.gmra.mxu2 %vm81_vm0, %v55_v21  ;;  %213 = vmatmul.msk.f32.vlgmr.msra.gmra.mxu3 %vm81_vm0, %v56_v22  ;;  %v74_v35 = vpop.permute.xlu0 %73 }
 0x101   :  { %v111_v26 = vpop.f32.mrf.mxu0  ;;  %v114_v27 = vpop.f32.mrf.mxu1 }
 0x102   :  { %v112_v28 = vadd.f32 %v111_v26, %v64_v23  ;;  %v115_v29 = vadd.f32 %v114_v27, %v69_v24 }
 0x104   :  { %v123_v30 = vmax.f32 %v112_v28, 0.0  ;;  %v124_v31 = vmax.f32 %v115_v29, 0.0 }
 0x106   :  { %128 = vst.msk [vmem:[%s428_s5] sm:$0xff] %vm127_vm2, %v123_v30  ;;  %v152_v32 = vsel %vm127_vm2, %v124_v31, 0.0  ;;  %v149_v33 = vsel %vm127_vm2, %v123_v30, 0.0  ;;  %v175_v40 = vmul.f32 %v124_v31, %v124_v31  ;;  %v174_v41 = vmul.f32 %v123_v30, %v123_v30 }
 0x107   :  { %129 = vst.msk [vmem:[%s428_s5 + $0x8] sm:$0xff] %vm127_vm2, %v124_v31  ;;  %153 = vadd.xlane.f32.xlu0 %v152_v32  ;;  %150 = vadd.xlane.f32.xlu2 %v149_v33 }
 0x108   :  { %v117_v36 = vpop.f32.mrf.mxu2  ;;  %v120_v37 = vpop.f32.mrf.mxu3  ;;  %v181_v45 = vsel %vm127_vm2, %v175_v40, 0.0  ;;  %v178_v46 = vsel %vm127_vm2, %v174_v41, 0.0 }
 0x109   :  { %v118_v38 = vadd.f32 %v117_v36, %v74_v35  ;;  %v121_v39 = vadd.f32 %v120_v37, %v79_v34 }
 0x10b   :  { %v125_v42 = vmax.f32 %v118_v38, 0.0  ;;  %v126_v43 = vmax.f32 %v121_v39, 0.0 }
 0x10d   :  { %130 = vst.msk [vmem:[%s428_s5 + $0x10] sm:$0xff] %vm127_vm2, %v125_v42  ;;  %v155_v44 = vsel %vm127_vm2, %v125_v42, 0.0  ;;  %v176_v47 = vmul.f32 %v125_v42, %v125_v42  ;;  %v158_v49 = vsel %vm127_vm2, %v126_v43, 0.0  ;;  %v177_v50 = vmul.f32 %v126_v43, %v126_v43 }
 0x10e   :  { %131 = vst.msk [vmem:[%s428_s5 + $0x18] sm:$0xff] %vm127_vm2, %v126_v43  ;;  %156 = vadd.xlane.f32.xlu1 %v155_v44 }
 0x10f   :  { %182 = vadd.xlane.f32.xlu0 %v181_v45  ;;  %179 = vadd.xlane.f32.xlu2 %v178_v46  ;;  %v184_v48 = vsel %vm127_vm2, %v176_v47, 0.0  ;;  %v187_v51 = vsel %vm127_vm2, %v177_v50, 0.0 }
 0x116   :  { %185 = vadd.xlane.f32.xlu1 %v184_v48 }
 0x117   :  { %159 = vadd.xlane.f32.xlu2 %v158_v49 }
 0x11f   :  { %188 = vadd.xlane.f32.xlu2 %v187_v51 }
 0x17a   :  { %v151_v54 = vpop.xlane.xlu2 %150  ;;  %v154_v55 = vpop.xlane.xlu0 %153 }
 0x17b   :  { %v161_v56 = vadd.f32 %v151_v54, %v145_v52  ;;  %v162_v57 = vadd.f32 %v154_v55, %v146_v53 }
 0x17d   :  { %166 = vst.msk [vmem:[%s426_s6] sm:$0xff] %vm136_vm1, %v161_v56 }
 0x17e   :  { %167 = vst.msk [vmem:[%s426_s6 + $0x8] sm:$0xff] %vm136_vm1, %v162_v57 }
 0x181   :  { %v157_v61 = vpop.xlane.xlu1 %156 }
 0x182   :  { %v163_v62 = vadd.f32 %v157_v61, %v147_v58  ;;  %v180_v63 = vpop.xlane.xlu2 %179  ;;  %v183_v0 = vpop.xlane.xlu0 %182 }
 0x183   :  { %v190_v1 = vadd.f32 %v180_v63, %v170_v59  ;;  %v191_v2 = vadd.f32 %v183_v0, %v171_v60 }
 0x184   :  { %168 = vst.msk [vmem:[%s426_s6 + $0x10] sm:$0xff] %vm136_vm1, %v163_v62 }
 0x185   :  { %194 = vst.msk [vmem:[%s427_s7] sm:$0xff] %vm136_vm1, %v190_v1 }
 0x186   :  { %195 = vst.msk [vmem:[%s427_s7 + $0x8] sm:$0xff] %vm136_vm1, %v191_v2 }
 0x189   :  { %v186_v5 = vpop.xlane.xlu1 %185 }
 0x18a   :  { %v192_v6 = vadd.f32 %v186_v5, %v172_v3  ;;  %v160_v7 = vpop.xlane.xlu2 %159 }
 0x18b   :  { %v164_v8 = vadd.f32 %v160_v7, %v148_v4 }
 0x18c   :  { %196 = vst.msk [vmem:[%s427_s7 + $0x10] sm:$0xff] %vm136_vm1, %v192_v6 }
 0x18d   :  { %169 = vst.msk [vmem:[%s426_s6 + $0x18] sm:$0xff] %vm136_vm1, %v164_v8 }
 0x192   :  { %v189_v10 = vpop.xlane.xlu2 %188 }
 0x193   :  { %v193_v11 = vadd.f32 %v189_v10, %v173_v9 }
 0x195   :  { %197 = vst.msk [vmem:[%s427_s7 + $0x18] sm:$0xff] %vm136_vm1, %v193_v11 }

// kernel: network_forward.6
= control target key start
LH: loop header
LB: loop body
LE: loop exit
PB: predicated region body
PF: predicated region fallthrough
CT: control target
= control target key end

     0   :  { %v126_v0 = vmov 0   ;;  %vm60_vm0 = vcmask 130048   ;;  %vm91_vm1 = vcmask 7168   ;;  %v127_v17 = vmov 0.0   ;;  %s217_s1 = inlined_call_operand.vmem [shape: f32[16,1], index: 1, kind: input, shape index: {}]   ;;  %s218_s0 = inlined_call_operand.vmem [shape: f32[16,1], index: 0, kind: input, shape index: {}]   ;;  %s219_s4 = inlined_call_operand.vmem [shape: f32[8,1], index: 4, kind: input, shape index: {}]   ;;  %s220_s2 = inlined_call_operand.vmem [shape: f32[16,8], index: 2, kind: input, shape index: {}]   ;;  %s221_s3 = inlined_call_operand.vmem [shape: f32[8,16], index: 3, kind: input, shape index: {}]   ;;  %s222_s6 = inlined_call_operand.vmem [shape: f32[8,1], index: 6, kind: output, shape index: {1}]   ;;  %s223_s7 = inlined_call_operand.vmem [shape: f32[8,1], index: 7, kind: output, shape index: {2}]   ;;  %s224_s5 = inlined_call_operand.vmem [shape: f32[8,8], index: 5, kind: output, shape index: {0}]  }
   0x1   :  { %124 = vset.pattern.permute.xlu1 %v126_v0  ;;  %123 = vset.pattern.permute.xlu0 %v126_v0  ;;  %v40_v1 = vld [vmem:[%s217_s1 + $0x8] sm:$0xff]  ;;  %v39_v3 = vld [vmem:[%s217_s1] sm:$0xff]  ;;  %92 = vst.msk [vmem:[%s222_s6] sm:$0xff] %vm91_vm1, %v127_v17  ;;  %vm85_vm2 = vcmask 64512  }
   0x2   :  { %v26_v2 = vld [vmem:[%s218_s0 + $0x8] sm:$0xff]  ;;  %48 = vperm.xlu1 %124, %v40_v1   ;;  %125 = vset.pattern.permute.xlu2 %v126_v0  ;;  %v25_v4 = vld [vmem:[%s218_s0] sm:$0xff]  ;;  %93 = vst.msk [vmem:[%s223_s7] sm:$0xff] %vm91_vm1, %v127_v17 }
   0x3   :  { %34 = vperm.xlu0 %123, %v26_v2   ;;  %v54_v5 = vld [vmem:[%s219_s4] sm:$0xff]  ;;  %v24_v6 = vld [vmem:[%s220_s2 + $0x8] sm:$0xff] }
   0x4   :  { %57 = vperm.xlu2 %125, %v54_v5   ;;  %v23_v11 = vld [vmem:[%s220_s2] sm:$0xff] }
   0x5   :  { %v53_v16 = vld [vmem:[%s221_s3] sm:$0xff] }
   0x8   :  { %v94_v25 = vld [vmem:[%s222_s6] sm:$0xff] }
   0x9   :  { %v101_v27 = vld [vmem:[%s223_s7] sm:$0xff] }
   0xa   :  { %43 = vperm.xlu1 %124, %v39_v3  }
   0xb   :  { %29 = vperm.xlu0 %123, %v25_v4  }
  0x5e   :  { %v58_v18 = vpop.permute.xlu2 %57 }
  0x74   :  { %v49_v7 = vpop.permute.xlu1 %48 }
  0x75   :  { %v35_v8 = vpop.permute.xlu0 %34 }
  0x76   :  { %v38_v9 = vmul.f32 %v35_v8, %v24_v6 }
  0x78   :  { %v52_v10 = vadd.f32 %v49_v7, %v38_v9 }
  0x7a   :  { %78 = vmatpush.msra.mxu0 %v52_v10 }
  0x7c   :  { %v44_v14 = vpop.permute.xlu1 %43 }
  0x7d   :  { %v30_v12 = vpop.permute.xlu0 %29 }
  0x7e   :  { %v37_v13 = vmul.f32 %v30_v12, %v23_v11 }
  0x80   :  { %v51_v15 = vadd.f32 %v44_v14, %v37_v13 }
  0x82   :  { %79 = vmatpush.msra.mxu0 %v51_v15 }
  0x83   :  { %120 = vmatmul.msk.f32.vlgmr.msra.gmra.mxu0 %vm60_vm0, %v53_v16 }
 0x100   :  { %v81_v19 = vpop.f32.mrf.mxu0 }
 0x101   :  { %v82_v20 = vadd.f32 %v81_v19, %v58_v18 }
 0x103   :  { %v84_v21 = vmax.f32 %v82_v20, 0.0 }
 0x105   :  { %v95_v22 = vsel %vm85_vm2, %v84_v21, 0.0  ;;  %86 = vst.msk [vmem:[%s224_s5] sm:$0xff] %vm85_vm2, %v84_v21  ;;  %v102_v23 = vmul.f32 %v84_v21, %v84_v21 }
 0x106   :  { %96 = vadd.xlane.f32.xlu2 %v95_v22 }
 0x107   :  { %v103_v24 = vsel %vm85_vm2, %v102_v23, 0.0 }
 0x108   :  { %104 = vadd.xlane.f32.xlu0 %v103_v24 }
 0x179   :  { %v97_v26 = vpop.xlane.xlu2 %96 }
 0x17a   :  { %v98_v28 = vadd.f32 %v97_v26, %v94_v25 }
 0x17b   :  { %v105_v29 = vpop.xlane.xlu0 %104 }
 0x17c   :  { %100 = vst.msk [vmem:[%s222_s6] sm:$0xff] %vm91_vm1, %v98_v28  ;;  %v106_v30 = vadd.f32 %v105_v29, %v101_v27 }
 0x17e   :  { %107 = vst.msk [vmem:[%s223_s7] sm:$0xff] %vm91_vm1, %v106_v30 }

// kernel: network_forward.7
= control target key start
LH: loop header
LB: loop body
LE: loop exit
PB: predicated region body
PF: predicated region fallthrough
CT: control target
= control target key end

     0   :  { %s167_s0 = inlined_call_operand.vmem [shape: f32[8,1], index: 0, kind: input, shape index: {}]   ;;  %s168_s1 = inlined_call_operand.vmem [shape: f32[8,1], index: 1, kind: input, shape index: {}]   ;;  %s169_s2 = inlined_call_operand.vmem [shape: f32[8,8], index: 2, kind: input, shape index: {}]   ;;  %s170_s3 = inlined_call_operand.vmem [shape: f32[4,8], index: 3, kind: input, shape index: {}]   ;;  %s171_s4 = inlined_call_operand.vmem [shape: f32[4,1], index: 4, kind: input, shape index: {}]   ;;  %s172_s5 = inlined_call_operand.hbm [shape: f32[4,8], index: 5, kind: output, shape index: {}]  }
   0x1   :  { %v22_v0 = vld [vmem:[%s167_s0] sm:$0xff] }
   0x2   :  { %10 = vsyncpa [#allocation3], 0  ;;  %v117_v1 = vmov 0   ;;  %v29_v2 = vld [vmem:[%s168_s1] sm:$0xff]  ;;  %vm43_vm0 = vcmask 64512   ;;  %s118_s1 = smov [#allocation2]  }
   0x3   :  { %89 = vset.pattern.permute.xlu0 %v117_v1  ;;  %90 = vset.pattern.permute.xlu1 %v117_v1  ;;  %v37_v3 = vld [vmem:[%s171_s4] sm:$0xf]  ;;  %s75_s4 = sshll.u32 %s118_s1, 4  ;;  %s77_s29 = sshll.u32 %s172_s5, 4  ;;  %vm68_vm1 = vcmask 60416   ;;  %s76_s4 = int_to_ptr.vmem [resolvable:$true] %s75_s4  ;;  %s78_s29 = int_to_ptr.hbm [resolvable:$true] %s77_s29 }
   0x4   :  { %25 = vperm.xlu0 %89, %v22_v0   ;;  %40 = vperm.xlu1 %90, %v37_v3   ;;  %v21_v5 = vld [vmem:[%s169_s2] sm:$0xff] }
   0x5   :  { %v36_v9 = vld [vmem:[%s170_s3] sm:$0xf] }
   0xc   :  { %32 = vperm.xlu0 %89, %v29_v2  }
  0x76   :  { %v26_v4 = vpop.permute.xlu0 %25  ;;  %v41_v10 = vpop.permute.xlu1 %40 }
  0x77   :  { %v28_v6 = vmul.f32 %v26_v4, %v21_v5 }
  0x7e   :  { %v33_v7 = vpop.permute.xlu0 %32 }
  0x7f   :  { %v35_v8 = vadd.f32 %v33_v7, %v28_v6 }
  0x81   :  { %62 = vmatpush.msra.mxu0 %v35_v8 }
  0x82   :  { %86 = vmatmul.msk.f32.vlgmr.msra.gmra.mxu0 %vm43_vm0, %v36_v9 }
  0xff   :  { %v64_v11 = vpop.f32.mrf.mxu0 }
 0x100   :  { %v65_v12 = vadd.f32 %v64_v11, %v41_v10 }
 0x102   :  { %v67_v13 = vmax.f32 %v65_v12, 0.0 }
 0x104   :  { %69 = vst.msk [vmem:[#allocation2] sm:$0xf] %vm68_vm1, %v67_v13 }
 0x105   :  { %80 = dma.vmem_to_hbm [thread:$0]  %s76_s4, 64, %s78_s29, [#allocation3]  }
 0x106   :  { %115 = dma.done.wait [#allocation3], 64  }
 0x107   :  { %116 = vsyncadd [#allocation3], 4294967232 }
 0x108   :  { %85 = vsyncpa [#allocation3], 1 }

</bundles_post_ra>
